<compile_context>
chip_gen: v6e
topology: v6e:2x2x1
jax: 0.10.0
libtpu: 0.0.40
codegen_flags: <defaults>
</compile_context>

<pallas_src>
import math
import functools

import jax
import jax.numpy as jnp
from jax.experimental import pallas as pl
from jax.experimental.pallas import tpu as pltpu

EPS = 1e-5

CFG = dict(
    emb_dim=64,        # d_in == d_out
    n_heads=4,
    n_kv_groups=2,
    context_length=8,
    hidden_dim=128,    # FeedForward hidden dim
    rope_base=10000,
)


def transformer_block_kernel(
    x_ref, n1_ref, wqkv_ref, wo_ref, n2_ref, w12_ref, w3_ref,
    cos_ref, sina_ref, sinb_ref, mask_ref, o_ref,
    *, batch, seq, n_heads, n_kv_groups, hidden_dim,
):
    B, T, H, G, Hff = batch, seq, n_heads, n_kv_groups, hidden_dim
    D = x_ref.shape[1]
    hd = D // H
    half = hd // 2
    gs = H // G
    kvd = G * hd
    W = D + 2 * kvd                      # fused QKV width
    inv_scale = 1.0 / math.sqrt(hd)

    x = x_ref[...]                       # (B*T, D) f32
    shortcut = x

    # ---------------- RMSNorm 1 ----------------
    ms = jnp.mean(x * x, axis=-1, keepdims=True)
    xb = (x * jax.lax.rsqrt(ms + EPS) * n1_ref[...]).astype(jnp.bfloat16)

    # ---------------- fused QKV projection (one 128-wide MXU matmul) ----------------
    qkv = jnp.dot(xb, wqkv_ref[...], preferred_element_type=jnp.float32)   # (B*T, W) f32

    # ---------------- whole-tensor RoPE over the Q|K columns ----------------
    # out = qkv*cos + roll(+half)*sinA + roll(-half)*sinB, with the rotate-half sign and the
    # per-half selection baked into the precomputed sinA/sinB tables (identity over V columns).
    rolled_fwd = jnp.concatenate([qkv[:, half:], qkv[:, :half]], axis=-1)      # col i -> i+half (mod W)
    rolled_bwd = jnp.concatenate([qkv[:, W - half:], qkv[:, :W - half]], axis=-1)  # col i -> i-half (mod W)
    roped = (qkv * cos_ref[...]
             + rolled_fwd * sina_ref[...]
             + rolled_bwd * sinb_ref[...])                                    # (B*T, W) f32

    q = roped[:, :D]
    k = roped[:, D:D + kvd]
    v = roped[:, D + kvd:]

    # ---------------- batched GQA attention ----------------
    # Stack every (batch, head) pair along the row axis -> attention for all pairs is just two
    # plain 2-D matmuls + one softmax; the precomputed block-diagonal causal mask zeroes out the
    # cross-pair score blocks exactly.
    q_rows, k_rows, v_rows = [], [], []
    for b in range(B):
        r0 = b * T
        for h in range(H):
            g = h // gs                       # grouped-query: head h uses kv group h // group_size
            q_rows.append(q[r0:r0 + T, h * hd:(h + 1) * hd])
            k_rows.append(k[r0:r0 + T, g * hd:(g + 1) * hd])
            v_rows.append(v[r0:r0 + T, g * hd:(g + 1) * hd])
    q_s = jnp.concatenate(q_rows, axis=0).astype(jnp.bfloat16)   # (B*H*T, hd)
    k_s = jnp.concatenate(k_rows, axis=0).astype(jnp.bfloat16)   # (B*H*T, hd)
    v_s = jnp.concatenate(v_rows, axis=0).astype(jnp.bfloat16)   # (B*H*T, hd)

    scores = jnp.einsum("td,sd->ts", q_s, k_s,
                        preferred_element_type=jnp.float32)      # (B*H*T, B*H*T) f32
    scores = scores * inv_scale + mask_ref[...]                  # scale BEFORE finite additive mask
    m = jnp.max(scores, axis=-1, keepdims=True)
    e = jnp.exp(scores - m)
    attn = (e / jnp.sum(e, axis=-1, keepdims=True)).astype(jnp.bfloat16)
    ctx_s = jnp.dot(attn, v_s, preferred_element_type=jnp.float32)   # (B*H*T, hd) f32

    # reassemble (B*T, D): heads back onto lanes, batches back onto rows
    ctx = jnp.concatenate(
        [jnp.concatenate(
            [ctx_s[(b * H + h) * T:(b * H + h + 1) * T, :] for h in range(H)],
            axis=-1)
         for b in range(B)],
        axis=0).astype(jnp.bfloat16)                                 # (B*T, D) bf16

    att_out = jnp.dot(ctx, wo_ref[...], preferred_element_type=jnp.float32)   # f32, no bf16 round-trip
    x = att_out + shortcut
    shortcut = x

    # ---------------- RMSNorm 2 + SwiGLU FeedForward (fused fc1|fc2 matmul) ----------------
    ms2 = jnp.mean(x * x, axis=-1, keepdims=True)
    xn2 = (x * jax.lax.rsqrt(ms2 + EPS) * n2_ref[...]).astype(jnp.bfloat16)

    h12 = jnp.dot(xn2, w12_ref[...], preferred_element_type=jnp.float32)   # (B*T, 2*Hff)
    h1 = h12[:, :Hff]
    h2 = h12[:, Hff:]
    hmid = (h1 * jax.nn.sigmoid(h1) * h2).astype(jnp.bfloat16)             # SiLU(fc1) * fc2
    ff = jnp.dot(hmid, w3_ref[...], preferred_element_type=jnp.float32)    # (B*T, D) f32

    o_ref[...] = ff + shortcut


def transformer_block(x, n1, wq, wk, wv, wo, n2, w1, w2, w3, cos, sin, cfg=CFG):
    B, T, D = x.shape
    H = cfg["n_heads"]
    G = cfg["n_kv_groups"]
    hd = D // H
    half = hd // 2
    kvd = G * hd
    Hff = w1.shape[1]
    W = D + 2 * kvd

    # ---- fused weights (done once at the JAX level) ----
    wqkv = jnp.concatenate([wq, wk, wv], axis=1)         # (D, W) bf16
    w12 = jnp.concatenate([w1, w2], axis=1)              # (D, 2*Hff) bf16

    # ---- RoPE tables expanded to the full fused-QKV width (lane-dense), tiled over heads/groups
    #      and batch; V columns get identity (cos=1, sin terms 0). Rotate-half sign folded in. ----
    cos_q = jnp.tile(cos, (1, H))                        # (T, D)
    sin_q = jnp.tile(sin, (1, H))
    cos_k = jnp.tile(cos, (1, G))                        # (T, kvd)
    sin_k = jnp.tile(sin, (1, G))
    jq = jnp.arange(D) % hd
    jk = jnp.arange(kvd) % hd
    sina_q = jnp.where(jq < half, -sin_q, 0.0)
    sinb_q = jnp.where(jq >= half, sin_q, 0.0)
    sina_k = jnp.where(jk < half, -sin_k, 0.0)
    sinb_k = jnp.where(jk >= half, sin_k, 0.0)
    v_one = jnp.ones((T, kvd), jnp.float32)
    v_zero = jnp.zeros((T, kvd), jnp.float32)
    cos_t = jnp.tile(jnp.concatenate([cos_q, cos_k, v_one], axis=1), (B, 1))     # (B*T, W)
    sina_t = jnp.tile(jnp.concatenate([sina_q, sina_k, v_zero], axis=1), (B, 1))
    sinb_t = jnp.tile(jnp.concatenate([sinb_q, sinb_k, v_zero], axis=1), (B, 1))

    # ---- block-diagonal causal additive mask over the stacked (batch*head) rows ----
    N = B * H
    ridx = jnp.arange(N * T)
    blk = ridx // T
    pos = ridx % T
    allowed = (blk[:, None] == blk[None, :]) & (pos[None, :] <= pos[:, None])
    attn_mask = jnp.where(allowed, 0.0, -1e30).astype(jnp.float32)               # (N*T, N*T)

    x2 = x.reshape(B * T, D)

    kernel = functools.partial(
        transformer_block_kernel,
        batch=B, seq=T, n_heads=H, n_kv_groups=G, hidden_dim=Hff)

    def full(shape):
        return pl.BlockSpec(shape, lambda i: (0,) * len(shape))

    out = pl.pallas_call(
        kernel,
        out_shape=jax.ShapeDtypeStruct((B * T, D), jnp.float32),
        grid=(1,),                           # single step: whole (tiny) problem in one invocation
        in_specs=[
            full((B * T, D)),                # x (batch folded into rows)
            full((1, D)),                    # norm1 weight
            full((D, W)),                    # fused Wq|Wk|Wv
            full((D, D)),                    # out_proj
            full((1, D)),                    # norm2 weight
            full((D, 2 * Hff)),              # fused fc1|fc2
            full((Hff, D)),                  # fc3
            full((B * T, W)),                # RoPE cos table
            full((B * T, W)),                # RoPE signed-sin (first half) table
            full((B * T, W)),                # RoPE signed-sin (second half) table
            full((N * T, N * T)),            # block-diagonal causal additive mask
        ],
        out_specs=full((B * T, D)),
        compiler_params=pltpu.CompilerParams(
            dimension_semantics=("arbitrary",)),
    )(x2, n1, wqkv, wo, n2, w12, w3, cos_t, sina_t, sinb_t, attn_mask)

    # TODO(synk): output last dim is 64 (<128 lanes) -> one masked store; a (B, T*D) lane-dense store
    # would need an in-kernel lane reshape whose relayout cost exceeds the single masked store here.
    return out.reshape(B, T, D)


def reference_block(x, n1, wq, wk, wv, wo, n2, w1, w2, w3, cos, sin, cfg):
    """Pure-JAX reference with the same dtype/cast structure (mirrors the torch module)."""
    B, T, D = x.shape
    H = cfg["n_heads"]
    G = cfg["n_kv_groups"]
    hd = D // H
    gs = H // G
    half = hd // 2

    def rmsnorm(v, w):
        ms = jnp.mean(v * v, axis=-1, keepdims=True)
        return v * jax.lax.rsqrt(ms + EPS) * w

    def rope(t):                                  # (..., T, hd)
        t1 = t[..., :half]
        t2 = t[..., half:]
        rot = jnp.concatenate([-t2, t1], axis=-1)
        return t * cos + rot * sin

    shortcut = x
    xb = rmsnorm(x, n1).astype(jnp.bfloat16)

    q = jnp.einsum("btd,de->bte", xb, wq, preferred_element_type=jnp.float32)
    k = jnp.einsum("btd,de->bte", xb, wk, preferred_element_type=jnp.float32)
    v = jnp.einsum("btd,de->bte", xb, wv, preferred_element_type=jnp.float32)

    q = q.reshape(B, T, H, hd).transpose(0, 2, 1, 3)    # (B,H,T,hd)
    k = k.reshape(B, T, G, hd).transpose(0, 2, 1, 3)    # (B,G,T,hd)
    v = v.reshape(B, T, G, hd).transpose(0, 2, 1, 3)

    q = rope(q).astype(jnp.bfloat16)
    k = rope(k).astype(jnp.bfloat16)
    v = v.astype(jnp.bfloat16)
    k = jnp.repeat(k, gs, axis=1)                       # repeat_interleave over heads
    v = jnp.repeat(v, gs, axis=1)

    scores = jnp.einsum("bhtd,bhsd->bhts", q, k, preferred_element_type=jnp.float32)
    causal = jnp.arange(T)[None, :] > jnp.arange(T)[:, None]
    scores = jnp.where(causal, -jnp.inf, scores) / math.sqrt(hd)
    attn = jax.nn.softmax(scores, axis=-1)
    ctx = jnp.einsum("bhts,bhsd->bhtd", attn.astype(jnp.bfloat16), v,
                     preferred_element_type=jnp.float32)
    ctx = ctx.transpose(0, 2, 1, 3).reshape(B, T, D).astype(jnp.bfloat16)
    att_out = jnp.einsum("btd,de->bte", ctx, wo, preferred_element_type=jnp.float32)

    x = att_out + shortcut
    shortcut = x
    xn2 = rmsnorm(x, n2).astype(jnp.bfloat16)
    h1 = jnp.einsum("btd,dh->bth", xn2, w1, preferred_element_type=jnp.float32)
    h2 = jnp.einsum("btd,dh->bth", xn2, w2, preferred_element_type=jnp.float32)
    hmid = (h1 * jax.nn.sigmoid(h1) * h2).astype(jnp.bfloat16)
    ff = jnp.einsum("bth,hd->btd", hmid, w3, preferred_element_type=jnp.float32)
    return ff + shortcut


if __name__ == "__main__":
    B = 2
    T = CFG["context_length"]
    D = CFG["emb_dim"]
    Hff = CFG["hidden_dim"]
    hd = D // CFG["n_heads"]
    kvd = CFG["n_kv_groups"] * hd

    key = jax.random.PRNGKey(0)
    ks = jax.random.split(key, 12)

    x = jax.random.normal(ks[0], (B, T, D), dtype=jnp.float32)

    def lin_w(k, shape):
        return (0.05 * jax.random.normal(k, shape, dtype=jnp.float32)).astype(jnp.bfloat16)

    wq = lin_w(ks[1], (D, D))
    wk = lin_w(ks[2], (D, kvd))
    wv = lin_w(ks[3], (D, kvd))
    wo = lin_w(ks[4], (D, D))
    w1 = lin_w(ks[5], (D, Hff))
    w2 = lin_w(ks[6], (D, Hff))
    w3 = lin_w(ks[7], (Hff, D))
    n1 = (jnp.ones((1, D), jnp.float32)
          + 0.1 * jax.random.normal(ks[8], (1, D), dtype=jnp.float32))
    n2 = (jnp.ones((1, D), jnp.float32)
          + 0.1 * jax.random.normal(ks[9], (1, D), dtype=jnp.float32))

    # RoPE tables (precompute_rope_params with rope_config=None)
    inv_freq = 1.0 / (CFG["rope_base"] **
                      (jnp.arange(0, hd, 2, dtype=jnp.float32) / hd))
    pos = jnp.arange(T, dtype=jnp.float32)
    angles = pos[:, None] * inv_freq[None, :]
    angles = jnp.concatenate([angles, angles], axis=1)      # (T, hd)
    cos, sin = jnp.cos(angles), jnp.sin(angles)

    out = transformer_block(x, n1, wq, wk, wv, wo, n2, w1, w2, w3, cos, sin)
    out = jax.block_until_ready(out)

    assert out.shape == (B, T, D), out.shape
    assert out.dtype == jnp.float32, out.dtype
    assert bool(jnp.all(jnp.isfinite(out)))

    ref = reference_block(x, n1, wq, wk, wv, wo, n2, w1, w2, w3, cos, sin, CFG)
    assert bool(jnp.allclose(out, ref, atol=2e-2, rtol=2e-2)), \
        float(jnp.max(jnp.abs(out - ref)))

    print("KERNEL_OK")
</pallas_src>

<mosaic_0001>
module attributes {stable_mosaic.version = 11 : i64} {
  func.func @transformer_block_kernel(%arg0: i32, %arg1: memref<16x64xf32, #tpu.memory_space<vmem>>, %arg2: memref<1x64xf32, #tpu.memory_space<vmem>>, %arg3: memref<64x128xbf16, #tpu.memory_space<vmem>>, %arg4: memref<64x64xbf16, #tpu.memory_space<vmem>>, %arg5: memref<1x64xf32, #tpu.memory_space<vmem>>, %arg6: memref<64x256xbf16, #tpu.memory_space<vmem>>, %arg7: memref<128x64xbf16, #tpu.memory_space<vmem>>, %arg8: memref<16x128xf32, #tpu.memory_space<vmem>>, %arg9: memref<16x128xf32, #tpu.memory_space<vmem>>, %arg10: memref<16x128xf32, #tpu.memory_space<vmem>>, %arg11: memref<64x64xf32, #tpu.memory_space<vmem>>, %arg12: memref<16x64xf32, #tpu.memory_space<vmem>>) attributes {dimension_semantics = [#tpu.dimension_semantics<arbitrary>], iteration_bounds = array<i64: 1>, scalar_prefetch = 0 : i64, scratch_operands = 0 : i64, tpu.core_type = #tpu.core_type<tc>, window_params = [{pipeline_mode = #tpu.pipeline_mode<synchronous>, transform_indices = @transform_0, window_bounds = array<i64: 16, 64>}, {pipeline_mode = #tpu.pipeline_mode<synchronous>, transform_indices = @transform_1, window_bounds = array<i64: 1, 64>}, {pipeline_mode = #tpu.pipeline_mode<synchronous>, transform_indices = @transform_2, window_bounds = array<i64: 64, 128>}, {pipeline_mode = #tpu.pipeline_mode<synchronous>, transform_indices = @transform_3, window_bounds = array<i64: 64, 64>}, {pipeline_mode = #tpu.pipeline_mode<synchronous>, transform_indices = @transform_4, window_bounds = array<i64: 1, 64>}, {pipeline_mode = #tpu.pipeline_mode<synchronous>, transform_indices = @transform_5, window_bounds = array<i64: 64, 256>}, {pipeline_mode = #tpu.pipeline_mode<synchronous>, transform_indices = @transform_6, window_bounds = array<i64: 128, 64>}, {pipeline_mode = #tpu.pipeline_mode<synchronous>, transform_indices = @transform_7, window_bounds = array<i64: 16, 128>}, {pipeline_mode = #tpu.pipeline_mode<synchronous>, transform_indices = @transform_8, window_bounds = array<i64: 16, 128>}, {pipeline_mode = #tpu.pipeline_mode<synchronous>, transform_indices = @transform_9, window_bounds = array<i64: 16, 128>}, {pipeline_mode = #tpu.pipeline_mode<synchronous>, transform_indices = @transform_10, window_bounds = array<i64: 64, 64>}, {pipeline_mode = #tpu.pipeline_mode<synchronous>, transform_indices = @transform_11, window_bounds = array<i64: 16, 64>}]} {
    %c0 = arith.constant 0 : index
    %c0_0 = arith.constant 0 : index
    %0 = vector.load %arg1[%c0, %c0_0] : memref<16x64xf32, #tpu.memory_space<vmem>>, vector<16x64xf32>
    %1 = arith.mulf %0, %0 : vector<16x64xf32>
    %cst = arith.constant dense<0.000000e+00> : vector<16xf32>
    %2 = vector.multi_reduction <add>, %1, %cst [1] : vector<16x64xf32> to vector<16xf32>
    %3 = vector.shape_cast %2 : vector<16xf32> to vector<16x1xf32>
    %cst_1 = arith.constant 6.400000e+01 : f32
    %4 = vector.broadcast %cst_1 : f32 to vector<16x1xf32>
    %5 = arith.divf %3, %4 : vector<16x1xf32>
    %cst_2 = arith.constant 9.99999974E-6 : f32
    %6 = vector.broadcast %cst_2 : f32 to vector<16x1xf32>
    %7 = arith.addf %5, %6 : vector<16x1xf32>
    %8 = math.rsqrt %7 : vector<16x1xf32>
    %9 = vector.broadcast %8 : vector<16x1xf32> to vector<16x64xf32>
    %10 = arith.mulf %0, %9 : vector<16x64xf32>
    %c0_3 = arith.constant 0 : index
    %c0_4 = arith.constant 0 : index
    %11 = vector.load %arg2[%c0_3, %c0_4] : memref<1x64xf32, #tpu.memory_space<vmem>>, vector<1x64xf32>
    %12 = vector.broadcast %11 : vector<1x64xf32> to vector<16x64xf32>
    %13 = arith.mulf %10, %12 : vector<16x64xf32>
    %14 = arith.truncf %13 : vector<16x64xf32> to vector<16x64xbf16>
    %c0_5 = arith.constant 0 : index
    %c0_6 = arith.constant 0 : index
    %15 = vector.load %arg3[%c0_5, %c0_6] : memref<64x128xbf16, #tpu.memory_space<vmem>>, vector<64x128xbf16>
    %cst_7 = arith.constant dense<0.000000e+00> : vector<16x128xf32>
    %16 = tpu.matmul %14, %15, %cst_7 {dimension_numbers = #tpu.dot_dimension_numbers<[1], [0], [0], [1], [0, 0, 1, 1], [], []>} : vector<16x64xbf16>, vector<64x128xbf16>, vector<16x128xf32> -> vector<16x128xf32>
    %17 = vector.extract_strided_slice %16 {offsets = [0, 8], sizes = [16, 120], strides = [1, 1]} : vector<16x128xf32> to vector<16x120xf32>
    %18 = vector.extract_strided_slice %16 {offsets = [0, 0], sizes = [16, 8], strides = [1, 1]} : vector<16x128xf32> to vector<16x8xf32>
    %19 = tpu.concatenate %17, %18 in 1 : vector<16x120xf32>, vector<16x8xf32> -> vector<16x128xf32>
    %20 = vector.extract_strided_slice %16 {offsets = [0, 120], sizes = [16, 8], strides = [1, 1]} : vector<16x128xf32> to vector<16x8xf32>
    %21 = vector.extract_strided_slice %16 {offsets = [0, 0], sizes = [16, 120], strides = [1, 1]} : vector<16x128xf32> to vector<16x120xf32>
    %22 = tpu.concatenate %20, %21 in 1 : vector<16x8xf32>, vector<16x120xf32> -> vector<16x128xf32>
    %c0_8 = arith.constant 0 : index
    %c0_9 = arith.constant 0 : index
    %23 = vector.load %arg8[%c0_8, %c0_9] : memref<16x128xf32, #tpu.memory_space<vmem>>, vector<16x128xf32>
    %24 = arith.mulf %16, %23 : vector<16x128xf32>
    %c0_10 = arith.constant 0 : index
    %c0_11 = arith.constant 0 : index
    %25 = vector.load %arg9[%c0_10, %c0_11] : memref<16x128xf32, #tpu.memory_space<vmem>>, vector<16x128xf32>
    %26 = arith.mulf %19, %25 : vector<16x128xf32>
    %27 = arith.addf %24, %26 : vector<16x128xf32>
    %c0_12 = arith.constant 0 : index
    %c0_13 = arith.constant 0 : index
    %28 = vector.load %arg10[%c0_12, %c0_13] : memref<16x128xf32, #tpu.memory_space<vmem>>, vector<16x128xf32>
    %29 = arith.mulf %22, %28 : vector<16x128xf32>
    %30 = arith.addf %27, %29 : vector<16x128xf32>
    %31 = vector.extract_strided_slice %30 {offsets = [0, 0], sizes = [16, 64], strides = [1, 1]} : vector<16x128xf32> to vector<16x64xf32>
    %32 = vector.extract_strided_slice %30 {offsets = [0, 64], sizes = [16, 32], strides = [1, 1]} : vector<16x128xf32> to vector<16x32xf32>
    %33 = vector.extract_strided_slice %30 {offsets = [0, 96], sizes = [16, 32], strides = [1, 1]} : vector<16x128xf32> to vector<16x32xf32>
    %34 = vector.extract_strided_slice %31 {offsets = [0, 0], sizes = [8, 16], strides = [1, 1]} : vector<16x64xf32> to vector<8x16xf32>
    %35 = vector.extract_strided_slice %32 {offsets = [0, 0], sizes = [8, 16], strides = [1, 1]} : vector<16x32xf32> to vector<8x16xf32>
    %36 = vector.extract_strided_slice %33 {offsets = [0, 0], sizes = [8, 16], strides = [1, 1]} : vector<16x32xf32> to vector<8x16xf32>
    %37 = vector.extract_strided_slice %31 {offsets = [0, 16], sizes = [8, 16], strides = [1, 1]} : vector<16x64xf32> to vector<8x16xf32>
    %38 = vector.extract_strided_slice %32 {offsets = [0, 0], sizes = [8, 16], strides = [1, 1]} : vector<16x32xf32> to vector<8x16xf32>
    %39 = vector.extract_strided_slice %33 {offsets = [0, 0], sizes = [8, 16], strides = [1, 1]} : vector<16x32xf32> to vector<8x16xf32>
    %40 = vector.extract_strided_slice %31 {offsets = [0, 32], sizes = [8, 16], strides = [1, 1]} : vector<16x64xf32> to vector<8x16xf32>
    %41 = vector.extract_strided_slice %32 {offsets = [0, 16], sizes = [8, 16], strides = [1, 1]} : vector<16x32xf32> to vector<8x16xf32>
    %42 = vector.extract_strided_slice %33 {offsets = [0, 16], sizes = [8, 16], strides = [1, 1]} : vector<16x32xf32> to vector<8x16xf32>
    %43 = vector.extract_strided_slice %31 {offsets = [0, 48], sizes = [8, 16], strides = [1, 1]} : vector<16x64xf32> to vector<8x16xf32>
    %44 = vector.extract_strided_slice %32 {offsets = [0, 16], sizes = [8, 16], strides = [1, 1]} : vector<16x32xf32> to vector<8x16xf32>
    %45 = vector.extract_strided_slice %33 {offsets = [0, 16], sizes = [8, 16], strides = [1, 1]} : vector<16x32xf32> to vector<8x16xf32>
    %46 = vector.extract_strided_slice %31 {offsets = [8, 0], sizes = [8, 16], strides = [1, 1]} : vector<16x64xf32> to vector<8x16xf32>
    %47 = vector.extract_strided_slice %32 {offsets = [8, 0], sizes = [8, 16], strides = [1, 1]} : vector<16x32xf32> to vector<8x16xf32>
    %48 = vector.extract_strided_slice %33 {offsets = [8, 0], sizes = [8, 16], strides = [1, 1]} : vector<16x32xf32> to vector<8x16xf32>
    %49 = vector.extract_strided_slice %31 {offsets = [8, 16], sizes = [8, 16], strides = [1, 1]} : vector<16x64xf32> to vector<8x16xf32>
    %50 = vector.extract_strided_slice %32 {offsets = [8, 0], sizes = [8, 16], strides = [1, 1]} : vector<16x32xf32> to vector<8x16xf32>
    %51 = vector.extract_strided_slice %33 {offsets = [8, 0], sizes = [8, 16], strides = [1, 1]} : vector<16x32xf32> to vector<8x16xf32>
    %52 = vector.extract_strided_slice %31 {offsets = [8, 32], sizes = [8, 16], strides = [1, 1]} : vector<16x64xf32> to vector<8x16xf32>
    %53 = vector.extract_strided_slice %32 {offsets = [8, 16], sizes = [8, 16], strides = [1, 1]} : vector<16x32xf32> to vector<8x16xf32>
    %54 = vector.extract_strided_slice %33 {offsets = [8, 16], sizes = [8, 16], strides = [1, 1]} : vector<16x32xf32> to vector<8x16xf32>
    %55 = vector.extract_strided_slice %31 {offsets = [8, 48], sizes = [8, 16], strides = [1, 1]} : vector<16x64xf32> to vector<8x16xf32>
    %56 = vector.extract_strided_slice %32 {offsets = [8, 16], sizes = [8, 16], strides = [1, 1]} : vector<16x32xf32> to vector<8x16xf32>
    %57 = vector.extract_strided_slice %33 {offsets = [8, 16], sizes = [8, 16], strides = [1, 1]} : vector<16x32xf32> to vector<8x16xf32>
    %58 = tpu.concatenate %34, %37, %40, %43, %46, %49, %52, %55 in 0 : vector<8x16xf32>, vector<8x16xf32>, vector<8x16xf32>, vector<8x16xf32>, vector<8x16xf32>, vector<8x16xf32>, vector<8x16xf32>, vector<8x16xf32> -> vector<64x16xf32>
    %59 = arith.truncf %58 : vector<64x16xf32> to vector<64x16xbf16>
    %60 = tpu.concatenate %35, %38, %41, %44, %47, %50, %53, %56 in 0 : vector<8x16xf32>, vector<8x16xf32>, vector<8x16xf32>, vector<8x16xf32>, vector<8x16xf32>, vector<8x16xf32>, vector<8x16xf32>, vector<8x16xf32> -> vector<64x16xf32>
    %61 = arith.truncf %60 : vector<64x16xf32> to vector<64x16xbf16>
    %62 = tpu.concatenate %36, %39, %42, %45, %48, %51, %54, %57 in 0 : vector<8x16xf32>, vector<8x16xf32>, vector<8x16xf32>, vector<8x16xf32>, vector<8x16xf32>, vector<8x16xf32>, vector<8x16xf32>, vector<8x16xf32> -> vector<64x16xf32>
    %63 = arith.truncf %62 : vector<64x16xf32> to vector<64x16xbf16>
    "tpu.trace_start"() <{level = 10 : i32, message = "td,sd->ts"}> : () -> ()
    %cst_14 = arith.constant dense<0.000000e+00> : vector<64x64xf32>
    %64 = tpu.matmul %59, %61, %cst_14 {dimension_numbers = #tpu.dot_dimension_numbers<[1], [1], [0], [0], [0, 0, 1, 0], [], []>} : vector<64x16xbf16>, vector<64x16xbf16>, vector<64x64xf32> -> vector<64x64xf32>
    "tpu.trace_stop"() : () -> ()
    %cst_15 = arith.constant 2.500000e-01 : f32
    %65 = vector.broadcast %cst_15 : f32 to vector<64x64xf32>
    %66 = arith.mulf %64, %65 : vector<64x64xf32>
    %c0_16 = arith.constant 0 : index
    %c0_17 = arith.constant 0 : index
    %67 = vector.load %arg11[%c0_16, %c0_17] : memref<64x64xf32, #tpu.memory_space<vmem>>, vector<64x64xf32>
    %68 = arith.addf %66, %67 : vector<64x64xf32>
    %cst_18 = arith.constant dense<0xFF800000> : vector<64xf32>
    %69 = vector.multi_reduction <maximumf>, %68, %cst_18 [1] : vector<64x64xf32> to vector<64xf32>
    %70 = vector.shape_cast %69 : vector<64xf32> to vector<64x1xf32>
    %71 = vector.broadcast %70 : vector<64x1xf32> to vector<64x64xf32>
    %72 = arith.subf %68, %71 : vector<64x64xf32>
    %73 = math.exp %72 : vector<64x64xf32>
    %cst_19 = arith.constant dense<0.000000e+00> : vector<64xf32>
    %74 = vector.multi_reduction <add>, %73, %cst_19 [1] : vector<64x64xf32> to vector<64xf32>
    %75 = vector.shape_cast %74 : vector<64xf32> to vector<64x1xf32>
    %76 = vector.broadcast %75 : vector<64x1xf32> to vector<64x64xf32>
    %77 = arith.divf %73, %76 : vector<64x64xf32>
    %78 = arith.truncf %77 : vector<64x64xf32> to vector<64x64xbf16>
    %cst_20 = arith.constant dense<0.000000e+00> : vector<64x16xf32>
    %79 = tpu.matmul %78, %63, %cst_20 {dimension_numbers = #tpu.dot_dimension_numbers<[1], [0], [0], [1], [0, 0, 1, 1], [], []>} : vector<64x64xbf16>, vector<64x16xbf16>, vector<64x16xf32> -> vector<64x16xf32>
    %80 = vector.extract_strided_slice %79 {offsets = [0, 0], sizes = [8, 16], strides = [1, 1]} : vector<64x16xf32> to vector<8x16xf32>
    %81 = vector.extract_strided_slice %79 {offsets = [8, 0], sizes = [8, 16], strides = [1, 1]} : vector<64x16xf32> to vector<8x16xf32>
    %82 = vector.extract_strided_slice %79 {offsets = [16, 0], sizes = [8, 16], strides = [1, 1]} : vector<64x16xf32> to vector<8x16xf32>
    %83 = vector.extract_strided_slice %79 {offsets = [24, 0], sizes = [8, 16], strides = [1, 1]} : vector<64x16xf32> to vector<8x16xf32>
    %84 = tpu.concatenate %80, %81, %82, %83 in 1 : vector<8x16xf32>, vector<8x16xf32>, vector<8x16xf32>, vector<8x16xf32> -> vector<8x64xf32>
    %85 = vector.extract_strided_slice %79 {offsets = [32, 0], sizes = [8, 16], strides = [1, 1]} : vector<64x16xf32> to vector<8x16xf32>
    %86 = vector.extract_strided_slice %79 {offsets = [40, 0], sizes = [8, 16], strides = [1, 1]} : vector<64x16xf32> to vector<8x16xf32>
    %87 = vector.extract_strided_slice %79 {offsets = [48, 0], sizes = [8, 16], strides = [1, 1]} : vector<64x16xf32> to vector<8x16xf32>
    %88 = vector.extract_strided_slice %79 {offsets = [56, 0], sizes = [8, 16], strides = [1, 1]} : vector<64x16xf32> to vector<8x16xf32>
    %89 = tpu.concatenate %85, %86, %87, %88 in 1 : vector<8x16xf32>, vector<8x16xf32>, vector<8x16xf32>, vector<8x16xf32> -> vector<8x64xf32>
    %90 = tpu.concatenate %84, %89 in 0 : vector<8x64xf32>, vector<8x64xf32> -> vector<16x64xf32>
    %91 = arith.truncf %90 : vector<16x64xf32> to vector<16x64xbf16>
    %c0_21 = arith.constant 0 : index
    %c0_22 = arith.constant 0 : index
    %92 = vector.load %arg4[%c0_21, %c0_22] : memref<64x64xbf16, #tpu.memory_space<vmem>>, vector<64x64xbf16>
    %cst_23 = arith.constant dense<0.000000e+00> : vector<16x64xf32>
    %93 = tpu.matmul %91, %92, %cst_23 {dimension_numbers = #tpu.dot_dimension_numbers<[1], [0], [0], [1], [0, 0, 1, 1], [], []>} : vector<16x64xbf16>, vector<64x64xbf16>, vector<16x64xf32> -> vector<16x64xf32>
    %94 = arith.addf %93, %0 : vector<16x64xf32>
    %95 = arith.mulf %94, %94 : vector<16x64xf32>
    %cst_24 = arith.constant dense<0.000000e+00> : vector<16xf32>
    %96 = vector.multi_reduction <add>, %95, %cst_24 [1] : vector<16x64xf32> to vector<16xf32>
    %97 = vector.shape_cast %96 : vector<16xf32> to vector<16x1xf32>
    %cst_25 = arith.constant 6.400000e+01 : f32
    %98 = vector.broadcast %cst_25 : f32 to vector<16x1xf32>
    %99 = arith.divf %97, %98 : vector<16x1xf32>
    %cst_26 = arith.constant 9.99999974E-6 : f32
    %100 = vector.broadcast %cst_26 : f32 to vector<16x1xf32>
    %101 = arith.addf %99, %100 : vector<16x1xf32>
    %102 = math.rsqrt %101 : vector<16x1xf32>
    %103 = vector.broadcast %102 : vector<16x1xf32> to vector<16x64xf32>
    %104 = arith.mulf %94, %103 : vector<16x64xf32>
    %c0_27 = arith.constant 0 : index
    %c0_28 = arith.constant 0 : index
    %105 = vector.load %arg5[%c0_27, %c0_28] : memref<1x64xf32, #tpu.memory_space<vmem>>, vector<1x64xf32>
    %106 = vector.broadcast %105 : vector<1x64xf32> to vector<16x64xf32>
    %107 = arith.mulf %104, %106 : vector<16x64xf32>
    %108 = arith.truncf %107 : vector<16x64xf32> to vector<16x64xbf16>
    %c0_29 = arith.constant 0 : index
    %c0_30 = arith.constant 0 : index
    %109 = vector.load %arg6[%c0_29, %c0_30] : memref<64x256xbf16, #tpu.memory_space<vmem>>, vector<64x256xbf16>
    %cst_31 = arith.constant dense<0.000000e+00> : vector<16x256xf32>
    %110 = tpu.matmul %108, %109, %cst_31 {dimension_numbers = #tpu.dot_dimension_numbers<[1], [0], [0], [1], [0, 0, 1, 1], [], []>} : vector<16x64xbf16>, vector<64x256xbf16>, vector<16x256xf32> -> vector<16x256xf32>
    %111 = vector.extract_strided_slice %110 {offsets = [0, 0], sizes = [16, 128], strides = [1, 1]} : vector<16x256xf32> to vector<16x128xf32>
    %112 = vector.extract_strided_slice %110 {offsets = [0, 128], sizes = [16, 128], strides = [1, 1]} : vector<16x256xf32> to vector<16x128xf32>
    %113 = arith.negf %111 : vector<16x128xf32>
    %114 = math.exp %113 : vector<16x128xf32>
    %cst_32 = arith.constant 1.000000e+00 : f32
    %115 = vector.broadcast %cst_32 : f32 to vector<16x128xf32>
    %116 = arith.addf %115, %114 : vector<16x128xf32>
    %117 = arith.divf %115, %116 : vector<16x128xf32>
    %118 = arith.mulf %111, %117 : vector<16x128xf32>
    %119 = arith.mulf %118, %112 : vector<16x128xf32>
    %120 = arith.truncf %119 : vector<16x128xf32> to vector<16x128xbf16>
    %c0_33 = arith.constant 0 : index
    %c0_34 = arith.constant 0 : index
    %121 = vector.load %arg7[%c0_33, %c0_34] : memref<128x64xbf16, #tpu.memory_space<vmem>>, vector<128x64xbf16>
    %cst_35 = arith.constant dense<0.000000e+00> : vector<16x64xf32>
    %122 = tpu.matmul %120, %121, %cst_35 {dimension_numbers = #tpu.dot_dimension_numbers<[1], [0], [0], [1], [0, 0, 1, 1], [], []>} : vector<16x128xbf16>, vector<128x64xbf16>, vector<16x64xf32> -> vector<16x64xf32>
    %123 = arith.addf %122, %94 : vector<16x64xf32>
    %c0_36 = arith.constant 0 : index
    %c0_37 = arith.constant 0 : index
    %124 = vector.load %arg12[%c0_36, %c0_37] : memref<16x64xf32, #tpu.memory_space<vmem>>, vector<16x64xf32>
    tpu.vector_store %arg12[%c0_36, %c0_37], %123 {strides = array<i32>} : memref<16x64xf32, #tpu.memory_space<vmem>>, vector<16x64xf32>,
    return
  }
  func.func @transform_0(%arg0: i32) -> (i32, i32) {
    %c0_i32 = arith.constant 0 : i32
    %c0_i32_0 = arith.constant 0 : i32
    %c0_i32_1 = arith.constant 0 : i32
    return %c0_i32, %c0_i32_0 : i32, i32
  }
  func.func @transform_1(%arg0: i32) -> (i32, i32) {
    %c0_i32 = arith.constant 0 : i32
    %c0_i32_0 = arith.constant 0 : i32
    %c0_i32_1 = arith.constant 0 : i32
    return %c0_i32, %c0_i32_0 : i32, i32
  }
  func.func @transform_2(%arg0: i32) -> (i32, i32) {
    %c0_i32 = arith.constant 0 : i32
    %c0_i32_0 = arith.constant 0 : i32
    %c0_i32_1 = arith.constant 0 : i32
    return %c0_i32, %c0_i32_0 : i32, i32
  }
  func.func @transform_3(%arg0: i32) -> (i32, i32) {
    %c0_i32 = arith.constant 0 : i32
    %c0_i32_0 = arith.constant 0 : i32
    %c0_i32_1 = arith.constant 0 : i32
    return %c0_i32, %c0_i32_0 : i32, i32
  }
  func.func @transform_4(%arg0: i32) -> (i32, i32) {
    %c0_i32 = arith.constant 0 : i32
    %c0_i32_0 = arith.constant 0 : i32
    %c0_i32_1 = arith.constant 0 : i32
    return %c0_i32, %c0_i32_0 : i32, i32
  }
  func.func @transform_5(%arg0: i32) -> (i32, i32) {
    %c0_i32 = arith.constant 0 : i32
    %c0_i32_0 = arith.constant 0 : i32
    %c0_i32_1 = arith.constant 0 : i32
    return %c0_i32, %c0_i32_0 : i32, i32
  }
  func.func @transform_6(%arg0: i32) -> (i32, i32) {
    %c0_i32 = arith.constant 0 : i32
    %c0_i32_0 = arith.constant 0 : i32
    %c0_i32_1 = arith.constant 0 : i32
    return %c0_i32, %c0_i32_0 : i32, i32
  }
  func.func @transform_7(%arg0: i32) -> (i32, i32) {
    %c0_i32 = arith.constant 0 : i32
    %c0_i32_0 = arith.constant 0 : i32
    %c0_i32_1 = arith.constant 0 : i32
    return %c0_i32, %c0_i32_0 : i32, i32
  }
  func.func @transform_8(%arg0: i32) -> (i32, i32) {
    %c0_i32 = arith.constant 0 : i32
    %c0_i32_0 = arith.constant 0 : i32
    %c0_i32_1 = arith.constant 0 : i32
    return %c0_i32, %c0_i32_0 : i32, i32
  }
  func.func @transform_9(%arg0: i32) -> (i32, i32) {
    %c0_i32 = arith.constant 0 : i32
    %c0_i32_0 = arith.constant 0 : i32
    %c0_i32_1 = arith.constant 0 : i32
    return %c0_i32, %c0_i32_0 : i32, i32
  }
  func.func @transform_10(%arg0: i32) -> (i32, i32) {
    %c0_i32 = arith.constant 0 : i32
    %c0_i32_0 = arith.constant 0 : i32
    %c0_i32_1 = arith.constant 0 : i32
    return %c0_i32, %c0_i32_0 : i32, i32
  }
  func.func @transform_11(%arg0: i32) -> (i32, i32) {
    %c0_i32 = arith.constant 0 : i32
    %c0_i32_0 = arith.constant 0 : i32
    %c0_i32_1 = arith.constant 0 : i32
    return %c0_i32, %c0_i32_0 : i32, i32
  }
}

</mosaic_0001>

<bundles_post_ra>
// kernel: tpu_custom_call.1
= control target key start
LH: loop header
LB: loop body
LE: loop exit
PB: predicated region body
PF: predicated region fallthrough
CT: control target
= control target key end

     0   :  { %16 = vsyncpa [#allocation3], 0  ;;  %s1717_s0 = inlined_call_operand.hbm [shape: f32[16,64], index: 0, kind: input, shape index: {}]   ;;  %s1718_s1 = inlined_call_operand.hbm [shape: f32[1,64], index: 1, kind: input, shape index: {}]   ;;  %s1719_s2 = inlined_call_operand.vmem [shape: bf16[64,128], index: 2, kind: input, shape index: {}]   ;;  %s1720_s3 = inlined_call_operand.hbm [shape: bf16[64,64], index: 3, kind: input, shape index: {}]   ;;  %s1721_s4 = inlined_call_operand.hbm [shape: f32[1,64], index: 4, kind: input, shape index: {}]   ;;  %s1722_s5 = inlined_call_operand.vmem [shape: bf16[64,256], index: 5, kind: input, shape index: {}]   ;;  %s1723_s6 = inlined_call_operand.vmem [shape: bf16[128,64], index: 6, kind: input, shape index: {}]   ;;  %s1724_s7 = inlined_call_operand.hbm [shape: f32[16,128], index: 7, kind: input, shape index: {}]   ;;  %s1725_s8 = inlined_call_operand.hbm [shape: f32[16,128], index: 8, kind: input, shape index: {}]   ;;  %s1726_s9 = inlined_call_operand.vmem [shape: f32[16,128], index: 9, kind: input, shape index: {}]   ;;  %s1727_s10 = inlined_call_operand.hbm [shape: f32[64,64], index: 10, kind: input, shape index: {}]   ;;  %s1728_s11 = inlined_call_operand.hbm [shape: f32[16,64], index: 11, kind: output, shape index: {}]  }
   0x1   :  { %17 = vsyncpa [#allocation6], 0 }
   0x2   :  { %18 = vsyncpa [#allocation9], 0 }
   0x3   :  { %19 = vsyncpa [#allocation12], 0 }
   0x4   :  { %20 = vsyncpa [#allocation4], 0  ;;  %s1412_s17 = smov [#allocation5]   ;;  %s1413_s19 = smov [#allocation8]  }
   0x5   :  { %s39_s18 = sshll.u32 %s1412_s17, 4  ;;  %s63_s20 = sshll.u32 %s1413_s19, 4  ;;  %s40_s18 = int_to_ptr.vmem [resolvable:$true] %s39_s18  ;;  %s64_s20 = int_to_ptr.vmem [resolvable:$true] %s63_s20 }
   0x6   :  { %s1250_s21 = scalar_lea.vmem %s40_s18, 16  ;;  %s1254_s22 = scalar_lea.vmem %s40_s18, 32 }
   0x7   :  { %p1251_p0 = scmp.ne.s32.totalorder %s40_s18, %s1250_s21  ;;  %p1255_p1 = scmp.lt.s32.totalorder %s40_s18, %s40_s18 }
   0x8   :  { %p1256_p2 = scmp.lt.s32.totalorder %s1254_s22, %s1250_s21 }
   0xa   :  { %p1257_p3 = por %p1256_p2, %p1255_p1 }
   0xc   :  { %p1258_p4 = pnand %p1257_p3, %p1251_p0 }
   0xe   :  { %1261 = shalt.err (!%p1258_p4)
}
   0xf   :  { %42 = dma.hbm_to_vmem [thread:$0]  %s1718_s1, 16, %s40_s18, [#allocation6]  }
  0x10   :  { %s1270_s25 = scalar_lea.vmem %s64_s20, 16  ;;  %s1274_s26 = scalar_lea.vmem %s64_s20, 32 }
  0x11   :  { %p1271_p5 = scmp.ne.s32.totalorder %s64_s20, %s1270_s25  ;;  %p1275_p6 = scmp.lt.s32.totalorder %s64_s20, %s64_s20 }
  0x12   :  { %p1276_p7 = scmp.lt.s32.totalorder %s1274_s26, %s1270_s25 }
  0x14   :  { %p1277_p8 = por %p1276_p7, %p1275_p6 }
  0x16   :  { %p1278_p9 = pnand %p1277_p8, %p1271_p5 }
  0x18   :  { %1281 = shalt.err (!%p1278_p9)
}
  0x19   :  { %66 = dma.hbm_to_vmem [thread:$0]  %s1721_s4, 16, %s64_s20, [#allocation9]  }
  0x1a   :  { %s1414_s29 = smov [#allocation11]   ;;  %s1415_s12 = smov [#allocation2]  }
  0x1b   :  { %s88_s30 = sshll.u32 %s1414_s29, 4  ;;  %s26_s13 = sshll.u32 %s1415_s12, 4  ;;  %s89_s30 = int_to_ptr.vmem [resolvable:$true] %s88_s30  ;;  %s27_s13 = int_to_ptr.vmem [resolvable:$true] %s26_s13 }
  0x1c   :  { %s1290_s14 = scalar_lea.vmem %s89_s30, 256  ;;  %p1295_p11 = scmp.lt.s32.totalorder %s89_s30, %s89_s30 }
  0x1d   :  { %p1291_p10 = scmp.ne.s32.totalorder %s89_s30, %s1290_s14  ;;  %p1296_p12 = scmp.lt.s32.totalorder %s1290_s14, %s1290_s14 }
  0x1f   :  { %p1297_p13 = por %p1296_p12, %p1295_p11 }
  0x21   :  { %p1298_p0 = pnand %p1297_p13, %p1291_p10 }
  0x23   :  { %1301 = shalt.err (!%p1298_p0)
}
  0x24   :  { %s1416_s1 = smov 128   ;;  %s1417_s15 = smov 8  }
  0x25   :  { %94 = dma.hbm_to_vmem [thread:$0]  %s1725_s8, 256, %s89_s30, [#allocation12], %s1416_s1, %s1416_s1, %s1417_s15  }
  0x26   :  { %s1310_s17 = scalar_lea.vmem %s27_s13, 256  ;;  %p1315_p2 = scmp.lt.s32.totalorder %s27_s13, %s27_s13 }
  0x27   :  { %p1311_p1 = scmp.ne.s32.totalorder %s27_s13, %s1310_s17  ;;  %p1316_p3 = scmp.lt.s32.totalorder %s1310_s17, %s1310_s17 }
  0x29   :  { %p1317_p4 = por %p1316_p3, %p1315_p2 }
  0x2b   :  { %p1318_p5 = pnand %p1317_p4, %p1311_p1 }
  0x2d   :  { %1321 = shalt.err (!%p1318_p5)
}
  0x2e   :  { %32 = dma.hbm_to_vmem [thread:$0]  %s1717_s0, 256, %s27_s13, [#allocation3], %s1416_s1, %s1416_s1, %s1417_s15  }
  0x2f   :  { %s1418_s20 = smov [#allocation7]  }
  0x30   :  { %s50_s21 = sshll.u32 %s1418_s20, 4  ;;  %s51_s21 = int_to_ptr.vmem [resolvable:$true] %s50_s21 }
  0x31   :  { %s1330_s22 = scalar_lea.vmem %s51_s21, 512  ;;  %p1335_p7 = scmp.lt.s32.totalorder %s51_s21, %s51_s21 }
  0x32   :  { %p1331_p6 = scmp.ne.s32.totalorder %s51_s21, %s1330_s22  ;;  %p1336_p8 = scmp.lt.s32.totalorder %s1330_s22, %s1330_s22 }
  0x34   :  { %p1337_p9 = por %p1336_p8, %p1335_p7 }
  0x36   :  { %p1338_p10 = pnand %p1337_p9, %p1331_p6 }
  0x38   :  { %1341 = shalt.err (!%p1338_p10)
}
  0x39   :  { %s1419_s8 = smov 64   ;;  %s1420_s23 = smov 4  }
  0x3a   :  { %56 = dma.hbm_to_vmem [thread:$0]  %s1720_s3, 512, %s51_s21, [#allocation6], %s1419_s8, %s1419_s8, %s1420_s23  }
  0x3b   :  { %s1421_s26 = smov [#allocation10]   ;;  %s1422_s27 = smov [#allocation13]  }
  0x3c   :  { %s76_s0 = sshll.u32 %s1421_s26, 4  ;;  %s102_s28 = sshll.u32 %s1422_s27, 4  ;;  %s77_s0 = int_to_ptr.vmem [resolvable:$true] %s76_s0  ;;  %s103_s28 = int_to_ptr.vmem [resolvable:$true] %s102_s28 }
  0x3d   :  { %s1350_s29 = scalar_lea.vmem %s77_s0, 256  ;;  %p1355_p12 = scmp.lt.s32.totalorder %s77_s0, %s77_s0 }
  0x3e   :  { %p1351_p11 = scmp.ne.s32.totalorder %s77_s0, %s1350_s29  ;;  %p1356_p13 = scmp.lt.s32.totalorder %s1350_s29, %s1350_s29 }
  0x40   :  { %p1357_p0 = por %p1356_p13, %p1355_p12 }
  0x42   :  { %p1358_p1 = pnand %p1357_p0, %p1351_p11 }
  0x44   :  { %1361 = shalt.err (!%p1358_p1)
}
  0x45   :  { %82 = dma.hbm_to_vmem [thread:$0]  %s1724_s7, 256, %s77_s0, [#allocation9], %s1416_s1, %s1416_s1, %s1417_s15  }
  0x46   :  { %s1370_s3 = scalar_lea.vmem %s103_s28, 1024  ;;  %p1375_p3 = scmp.lt.s32.totalorder %s103_s28, %s103_s28 }
  0x47   :  { %p1371_p2 = scmp.ne.s32.totalorder %s103_s28, %s1370_s3  ;;  %p1376_p4 = scmp.lt.s32.totalorder %s1370_s3, %s1370_s3 }
  0x49   :  { %p1377_p5 = por %p1376_p4, %p1375_p3 }
  0x4b   :  { %p1378_p6 = pnand %p1377_p5, %p1371_p2 }
  0x4d   :  { %1381 = shalt.err (!%p1378_p6)
}
  0x4e   :  { %108 = dma.hbm_to_vmem [thread:$0]  %s1727_s10, 1024, %s103_s28, [#allocation12], %s1416_s1, %s1416_s1, %s1417_s15  }
  0x4f   :  { %1402 = dma.done.wait [#allocation3], 256  }
  0x50   :  { %1403 = vsyncadd [#allocation3], 4294967040 }
  0x51   :  { %1404 = dma.done.wait [#allocation6], 528  }
  0x52   :  { %1405 = vsyncadd [#allocation6], 4294966768 }
  0x53   :  { %1406 = dma.done.wait [#allocation9], 272  }
  0x54   :  { %1407 = vsyncadd [#allocation9], 4294967024 }
  0x55   :  { %1408 = dma.done.wait [#allocation12], 1280  }
  0x56   :  { %1409 = vsyncadd [#allocation12], 4294966016  ;;  %v1529_v0 = vld [vmem:[#allocation2] sm:$0xff]  ;;  %vm135_vm0 = vcmask 523264   ;;  %v1531_v1 = vld [vmem:[#allocation2 + $0x8] sm:$0xff]  ;;  %v1423_v7 = vmov 0.0  }
  0x57   :  { %v133_v2 = vmul.f32 %v1529_v0, %v1529_v0  ;;  %v134_v3 = vmul.f32 %v1531_v1, %v1531_v1  ;;  %v1166_v6 = vld [vmem:[%s1719_s2 + $0x18] sm:$0xff]   ;;  %1049 = vmatprep.subr.bf16.mxu1 %v1423_v7  ;;  %vm1424_vm1 = vmmov 0   ;;  %v1167_v8 = vld [vmem:[%s1719_s2 + $0x10] sm:$0xff]   ;;  %v1168_v9 = vld [vmem:[%s1719_s2 + $0x8] sm:$0xff]   ;;  %s1426_s25 = smov 112   ;;  %s1427_s26 = smov 80  }
  0x58   :  { %1057 = vmatprep.mubr.msk.bf16.mxu1 %vm1424_vm1, %v1423_v7  ;;  %1050 = vmatpush3.bf16.msra.mxu1 %v1166_v6  ;;  %v1169_v10 = vld [vmem:[%s1719_s2] sm:$0xff]   ;;  %v975_v20 = vld [vmem:[#allocation5] ss:$0 sm:$0xff]  ;;  %s1425_s2 = smov 120   ;;  %v262_v35 = vld [vmem:[%s1726_s9 + $0x8] sm:$0xff]  ;;  %vm307_vm2 = vcmask 130048  }
  0x59   :  { %v136_v4 = vsel %vm135_vm0, %v133_v2, 0.0  ;;  %v139_v5 = vsel %vm135_vm0, %v134_v3, 0.0  ;;  %1051 = vmatprep.subr.bf16.mxu1 %v1423_v7  ;;  %v256_v29 = vld [vmem:[#allocation11 + $0x8] sm:$0xff]  ;;  %v252_v30 = vld [vmem:[#allocation10 + $0x8] sm:$0xff]  ;;  %v255_v33 = vld [vmem:[#allocation11] sm:$0xff]  ;;  %s1430_s0 = smov 16  }
  0x5a   :  { %137 = vadd.xlane.f32.xlu0 %v136_v4  ;;  %v251_v37 = vld [vmem:[#allocation10] sm:$0xff]  ;;  %v261_v42 = vld [vmem:[%s1726_s9] sm:$0xff]  ;;  %s1428_s9 = smov 96   ;;  %s1431_s27 = smov 48   ;;  %vm615_vm3 = vcmask 261120   ;;  %vm617_vm4 = vcmask 392192  }
  0x5c   :  { %1052 = vmatpush3.bf16.msra.mxu1 %v1167_v8 }
  0x5d   :  { %1053 = vmatprep.subr.bf16.mxu1 %v1423_v7 }
  0x5e   :  { %140 = vadd.xlane.f32.xlu0 %v139_v5 }
  0x60   :  { %1054 = vmatpush3.bf16.msra.mxu1 %v1168_v9 }
  0x61   :  { %1055 = vmatprep.subr.bf16.mxu1 %v1423_v7 }
  0x64   :  { %1056 = vmatpush3.bf16.msra.mxu1 %v1169_v10 }
  0xe3   :  { %v138_v11 = vpop.xlane.xlu0 %137 }
  0xe4   :  { %v143_v12 = vmul.f32 0.015625, %v138_v11 }
  0xe6   :  { %v145_v13 = vadd.f32 1e-05, %v143_v12  ;;  %v405_v12 = vld [vmem:[#allocation13] sm:$0xff] }
  0xe7   :  { %v141_v14 = vpop.xlane.xlu0 %140 }
  0xe8   :  { %1194 = vrsqrt.f32 %v145_v13  ;;  %v144_v15 = vmul.f32 0.015625, %v141_v14 }
  0xea   :  { %v146_v16 = vadd.f32 1e-05, %v144_v15  ;;  %v408_v15 = vld [vmem:[#allocation13 + $0x18] sm:$0xff] }
  0xec   :  { %1196 = vrsqrt.f32 %v146_v16 }
  0xf5   :  { %v1195_v17 = vpop.eup %1194 }
  0xf6   :  { %v149_v18 = vmul.f32 %v1195_v17, %v1529_v0 }
  0xf8   :  { %v158_v22 = vmul.f32 %v975_v20, %v149_v18 }
  0xf9   :  { %v1197_v19 = vpop.eup %1196 }
  0xfa   :  { %v150_v21 = vmul.f32 %v1197_v19, %v1531_v1 }
  0xfc   :  { %v159_v23 = vmul.f32 %v975_v20, %v150_v21  ;;  %v406_v20 = vld [vmem:[#allocation13 + $0x8] sm:$0xff] }
  0xfe   :  { %v160_v24 = vpack.c.bf16 %v159_v23, %v158_v22 }
 0x100   :  { %1058 = vmatmul.mubr.msk.bf16.vlgmr.msra.gmra.mxu1 %vm135_vm0, %v160_v24  ;;  %v407_v24 = vld [vmem:[#allocation13 + $0x10] sm:$0xff] }
 0x1c0   :  { %v230_v25 = vpop.f32.mrf.mxu1 }
 0x1c1   :  { %239 = vrot.lane.b32.xlu0 %v230_v25, %s1425_s2  ;;  %v253_v43 = vmul.f32 %v251_v37, %v230_v25 }
 0x1c2   :  { %v1059_v26 = vpop.f32.mrf.mxu1 }
 0x1c4   :  { %v233_v27 = vpop.f32.mrf.mxu1 }
 0x1c5   :  { %241 = vrot.lane.b32.xlu1 %v233_v27, %s1425_s2  ;;  %v254_v36 = vmul.f32 %v252_v30, %v233_v27 }
 0x1c6   :  { %v1060_v28 = vpop.f32.mrf.mxu1 }
 0x1c9   :  { %247 = vrot.lane.b32.xlu1 %v233_v27, %s1417_s15 }
 0x1cd   :  { %245 = vrot.lane.b32.xlu1 %v230_v25, %s1417_s15 }
 0x233   :  { %v240_v34 = vpop.permute.xlu0 %239 }
 0x234   :  { %v257_v39 = vmul.f32 %v255_v33, %v240_v34  ;;  %v409_v33 = vld [vmem:[#allocation13 + $0x20] sm:$0xff] }
 0x236   :  { %v259_v46 = vadd.f32 %v257_v39, %v253_v43 }
 0x237   :  { %v242_v31 = vpop.permute.xlu1 %241 }
 0x238   :  { %v258_v32 = vmul.f32 %v256_v29, %v242_v31 }
 0x23a   :  { %v260_v40 = vadd.f32 %v258_v32, %v254_v36  ;;  %v410_v36 = vld [vmem:[#allocation13 + $0x28] sm:$0xff] }
 0x23b   :  { %v248_v38 = vpop.permute.xlu1 %247 }
 0x23c   :  { %v264_v41 = vmul.f32 %v262_v35, %v248_v38 }
 0x23e   :  { %v266_v44 = vadd.f32 %v264_v41, %v260_v40  ;;  %v411_v41 = vld [vmem:[#allocation13 + $0x30] sm:$0xff] }
 0x23f   :  { %v246_v45 = vpop.permute.xlu1 %245 }
 0x240   :  { %v263_v47 = vmul.f32 %v261_v42, %v246_v45  ;;  %278 = vrot.lane.b32.xlu1 %v266_v44, %s1426_s25  ;;  %v1576_v54 = vpack.c.bf16 %v266_v44, %v266_v44  ;;  %v412_v42 = vld [vmem:[#allocation13 + $0x38] sm:$0xff] }
 0x242   :  { %v265_v48 = vadd.f32 %v263_v47, %v259_v46 }
 0x244   :  { %268 = vrot.lane.b32.xlu1 %v265_v48, %s1426_s25  ;;  %v1568_v49 = vpack.c.bf16 %v265_v48, %v265_v48 }
 0x246   :  { %299 = vrot.lane.b32.xlu0 %v1568_v49, %s1419_s8 }
 0x24a   :  { %274 = vrot.lane.b32.xlu0 %v265_v48, %s1427_s26 }
 0x24e   :  { %284 = vrot.lane.b32.xlu0 %v266_v44, %s1427_s26 }
 0x2b2   :  { %v279_v50 = vpop.permute.xlu1 %278 }
 0x2b3   :  { %v1572_v51 = vpack.c.bf16 %v279_v50, %v279_v50  ;;  %v289_v5 = vpack.c.bf16 %v279_v50, %v266_v44 }
 0x2b5   :  { %305 = vrot.lane.b32.xlu1 %v1572_v51, %s1419_s8 }
 0x2b6   :  { %v269_v52 = vpop.permute.xlu1 %268 }
 0x2b7   :  { %v287_v53 = vpack.c.bf16 %v269_v52, %v265_v48  ;;  %v1581_v55 = vpack.c.bf16 %v269_v52, %v269_v52 }
 0x2b8   :  { %v300_v62 = vpop.permute.xlu0 %299 }
 0x2b9   :  { %1069 = vmatprep.mubr.msk.bf16.mxu1 %vm307_vm2, %v287_v53  ;;  %303 = vrot.lane.b32.xlu1 %v1576_v54, %s1419_s8  ;;  %v321_v63 = vsel %vm307_vm2, %v300_v62, 0 }
 0x2bc   :  { %v275_v3 = vpop.permute.xlu0 %274 }
 0x2bd   :  { %301 = vrot.lane.b32.xlu1 %v1581_v55, %s1419_s8  ;;  %s1429_s8 = smov 32  }
 0x2c0   :  { %v285_v8 = vpop.permute.xlu0 %284 }
 0x2c1   :  { %271 = vrot.lane.b32.xlu1 %v265_v48, %s1428_s9 }
 0x2c5   :  { %281 = vrot.lane.b32.xlu1 %v266_v44, %s1428_s9 }
 0x327   :  { %v306_v56 = vpop.permute.xlu1 %305 }
 0x328   :  { %v330_v57 = vsel %vm307_vm2, %v306_v56, 0  ;;  %1125 = vmatprep.subr.msk.bf16.mxu1 %vm307_vm2, %v306_v56 }
 0x329   :  { %1062 = vmatpush3.bf16.xpose.msra.mxu1 %v330_v57 }
 0x32b   :  { %v304_v58 = vpop.permute.xlu1 %303 }
 0x32c   :  { %1126 = vmatprep.subr.msk.bf16.mxu1 %vm307_vm2, %v304_v58  ;;  %v327_v59 = vsel %vm307_vm2, %v304_v58, 0 }
 0x32f   :  { %v302_v60 = vpop.permute.xlu1 %301 }
 0x330   :  { %v324_v61 = vsel %vm307_vm2, %v302_v60, 0 }
 0x331   :  { %1064 = vmatpush3.bf16.xpose.msra.mxu1 %v327_v59 }
 0x332   :  { %1127 = vmatprep.subr.msk.bf16.mxu1 %vm307_vm2, %v302_v60 }
 0x333   :  { %v272_v2 = vpop.permute.xlu1 %271 }
 0x334   :  { %v288_v4 = vpack.c.bf16 %v275_v3, %v272_v2 }
 0x337   :  { %v282_v6 = vpop.permute.xlu1 %281 }
 0x338   :  { %v290_v9 = vpack.c.bf16 %v285_v8, %v282_v6 }
 0x339   :  { %1066 = vmatpush3.bf16.xpose.msra.mxu1 %v324_v61 }
 0x33a   :  { %1128 = vmatprep.subr.msk.bf16.mxu1 %vm307_vm2, %v300_v62 }
 0x341   :  { %1068 = vmatpush3.bf16.xpose.msra.mxu1 %v321_v63 }
 0x348   :  { %1070 = vmatmul.mubr.msk.bf16.vlgmr.msra.gmra.mxu1 %vm307_vm2, %v288_v4 }
 0x349   :  { %1073 = vmatprep.mubr.msk.bf16.mxu1 %vm307_vm2, %v289_v5 }
 0x350   :  { %1074 = vmatmul.mubr.msk.bf16.gmra.mxu1 %vm307_vm2, %v290_v9 }
 0x408   :  { %v1071_v10 = vpop.f32.mrf.mxu1 }
 0x409   :  { %v399_v18 = vmul.f32 0.25, %v1071_v10 }
 0x40a   :  { %v366_v11 = vpop.f32.mrf.mxu1 }
 0x40b   :  { %v397_v13 = vmul.f32 0.25, %v366_v11  ;;  %v415_v28 = vadd.f32 %v407_v24, %v399_v18 }
 0x40c   :  { %v1072_v14 = vpop.f32.mrf.mxu1 }
 0x40d   :  { %v400_v16 = vmul.f32 0.25, %v1072_v14  ;;  %v413_v17 = vadd.f32 %v405_v12, %v397_v13  ;;  %v427_v35 = vsel %vm135_vm0, %v415_v28, -inf }
 0x40e   :  { %v369_v19 = vpop.f32.mrf.mxu1 }
 0x40f   :  { %v398_v21 = vmul.f32 0.25, %v369_v19  ;;  %v421_v22 = vsel %vm135_vm0, %v413_v17, -inf  ;;  %v416_v23 = vadd.f32 %v408_v15, %v400_v16 }
 0x410   :  { %422 = vmax.xlane.f32.xlu1 %v421_v22  ;;  %v1075_v25 = vpop.f32.mrf.mxu1 }
 0x411   :  { %v414_v26 = vadd.f32 %v406_v20, %v398_v21  ;;  %v430_v30 = vsel %vm135_vm0, %v416_v23, -inf  ;;  %v403_v37 = vmul.f32 0.25, %v1075_v25 }
 0x412   :  { %v382_v27 = vpop.f32.mrf.mxu1 }
 0x413   :  { %v401_v29 = vmul.f32 0.25, %v382_v27  ;;  %v424_v31 = vsel %vm135_vm0, %v414_v26, -inf  ;;  %v419_v46 = vadd.f32 %v411_v41, %v403_v37 }
 0x414   :  { %431 = vmax.xlane.f32.xlu1 %v430_v30  ;;  %425 = vmax.xlane.f32.xlu0 %v424_v31  ;;  %v1076_v32 = vpop.f32.mrf.mxu1 }
 0x415   :  { %v404_v38 = vmul.f32 0.25, %v1076_v32  ;;  %v417_v40 = vadd.f32 %v409_v33, %v401_v29  ;;  %v439_v48 = vsel %vm135_vm0, %v419_v46, -inf }
 0x416   :  { %v385_v34 = vpop.f32.mrf.mxu1 }
 0x417   :  { %v402_v39 = vmul.f32 0.25, %v385_v34  ;;  %v433_v44 = vsel %vm135_vm0, %v417_v40, -inf  ;;  %v420_v47 = vadd.f32 %v412_v42, %v404_v38 }
 0x418   :  { %428 = vmax.xlane.f32.xlu0 %v427_v35 }
 0x419   :  { %v418_v43 = vadd.f32 %v410_v36, %v402_v39  ;;  %v442_v50 = vsel %vm135_vm0, %v420_v47, -inf }
 0x41b   :  { %v436_v45 = vsel %vm135_vm0, %v418_v43, -inf }
 0x41c   :  { %434 = vmax.xlane.f32.xlu0 %v433_v44  ;;  %437 = vmax.xlane.f32.xlu1 %v436_v45 }
 0x420   :  { %440 = vmax.xlane.f32.xlu0 %v439_v48  ;;  %443 = vmax.xlane.f32.xlu1 %v442_v50 }
 0x431   :  { %517 = vrot.lane.b32.xlu1 %v1576_v54, %s1429_s8 }
 0x436   :  { %519 = vrot.lane.b32.xlu0 %v1572_v51, %s1429_s8 }
 0x499   :  { %v423_v52 = vpop.xlane.xlu1 %422 }
 0x49a   :  { %v445_v59 = vsub.f32 %v413_v17, %v423_v52 }
 0x49c   :  { %v453_v2 = vmul.f32 1.442695, %v445_v59 }
 0x49d   :  { %v432_v53 = vpop.xlane.xlu1 %431  ;;  %v426_v56 = vpop.xlane.xlu0 %425 }
 0x49e   :  { %v448_v57 = vsub.f32 %v416_v23, %v432_v53  ;;  %v446_v58 = vsub.f32 %v414_v26, %v426_v56 }
 0x4a0   :  { %v459_v60 = vmul.f32 1.442695, %v448_v57  ;;  %v455_v61 = vmul.f32 1.442695, %v446_v58 }
 0x4a1   :  { %v429_v62 = vpop.xlane.xlu0 %428 }
 0x4a2   :  { %1198 = vpow2.f32 %v459_v60  ;;  %v447_v63 = vsub.f32 %v415_v28, %v429_v62 }
 0x4a3   :  { %1200 = vpow2.f32 %v455_v61 }
 0x4a4   :  { %v457_v3 = vmul.f32 1.442695, %v447_v63 }
 0x4a5   :  { %v435_v4 = vpop.xlane.xlu0 %434  ;;  %v438_v5 = vpop.xlane.xlu1 %437 }
 0x4a6   :  { %1202 = vpow2.f32 %v457_v3  ;;  %v449_v54 = vsub.f32 %v417_v40, %v435_v4  ;;  %v450_v51 = vsub.f32 %v418_v43, %v438_v5  ;;  %v1170_v3 = vld [vmem:[#allocation7 + $0x18] sm:$0xff]   ;;  %v1171_v4 = vld [vmem:[#allocation7 + $0x10] sm:$0xff]  }
 0x4a7   :  { %1204 = vpow2.f32 %v453_v2 }
 0x4a8   :  { %v461_v11 = vmul.f32 1.442695, %v449_v54  ;;  %v463_v14 = vmul.f32 1.442695, %v450_v51 }
 0x4a9   :  { %v441_v6 = vpop.xlane.xlu0 %440  ;;  %v444_v8 = vpop.xlane.xlu1 %443 }
 0x4aa   :  { %v451_v9 = vsub.f32 %v419_v46, %v441_v6  ;;  %v452_v10 = vsub.f32 %v420_v47, %v444_v8  ;;  %v1172_v6 = vld [vmem:[#allocation7 + $0x8] sm:$0xff]  }
 0x4ac   :  { %v465_v12 = vmul.f32 1.442695, %v451_v9  ;;  %v467_v13 = vmul.f32 1.442695, %v452_v10  ;;  %v1173_v10 = vld [vmem:[#allocation7] sm:$0xff]  }
 0x4ad   :  { %v520_v15 = vpop.permute.xlu0 %519  ;;  %v518_v17 = vpop.permute.xlu1 %517 }
 0x4ae   :  { %1206 = vpow2.f32 %v465_v12  ;;  %1077 = vmatprep.subr.bf16.mxu0 %v520_v15 }
 0x4af   :  { %v1199_v16 = vpop.eup %1198  ;;  %1208 = vpow2.f32 %v467_v13  ;;  %1078 = vmatpush3.bf16.msra.mxu0 %v520_v15 }
 0x4b0   :  { %1210 = vpow2.f32 %v461_v11  ;;  %1079 = vmatprep.subr.bf16.mxu0 %v518_v17  ;;  %v478_v18 = vsel %vm135_vm0, %v1199_v16, 0.0  ;;  %v1201_v19 = vpop.eup %1200 }
 0x4b1   :  { %1212 = vpow2.f32 %v463_v14  ;;  %479 = vadd.xlane.f32.xlu1 %v478_v18  ;;  %v472_v22 = vsel %vm135_vm0, %v1201_v19, 0.0 }
 0x4b3   :  { %v1203_v20 = vpop.eup %1202  ;;  %1080 = vmatpush3.bf16.msra.mxu0 %v518_v17 }
 0x4b4   :  { %v475_v21 = vsel %vm135_vm0, %v1203_v20, 0.0  ;;  %v1205_v23 = vpop.eup %1204 }
 0x4b5   :  { %476 = vadd.xlane.f32.xlu0 %v475_v21  ;;  %473 = vadd.xlane.f32.xlu1 %v472_v22  ;;  %v469_v24 = vsel %vm135_vm0, %v1205_v23, 0.0 }
 0x4b9   :  { %470 = vadd.xlane.f32.xlu0 %v469_v24 }
 0x4bb   :  { %v1207_v25 = vpop.eup %1206 }
 0x4bc   :  { %v1209_v26 = vpop.eup %1208  ;;  %v487_v27 = vsel %vm135_vm0, %v1207_v25, 0.0 }
 0x4bd   :  { %v1211_v28 = vpop.eup %1210  ;;  %488 = vadd.xlane.f32.xlu0 %v487_v27  ;;  %v490_v29 = vsel %vm135_vm0, %v1209_v26, 0.0 }
 0x4be   :  { %v1213_v30 = vpop.eup %1212  ;;  %491 = vadd.xlane.f32.xlu1 %v490_v29  ;;  %v481_v31 = vsel %vm135_vm0, %v1211_v28, 0.0 }
 0x4bf   :  { %v484_v32 = vsel %vm135_vm0, %v1213_v30, 0.0 }
 0x4c1   :  { %482 = vadd.xlane.f32.xlu0 %v481_v31 }
 0x4c2   :  { %485 = vadd.xlane.f32.xlu1 %v484_v32 }
 0x4d3   :  { %515 = vrot.lane.b32.xlu1 %v1581_v55, %s1429_s8 }
 0x4d7   :  { %513 = vrot.lane.b32.xlu0 %v1568_v49, %s1429_s8 }
 0x53a   :  { %v480_v33 = vpop.xlane.xlu1 %479 }
 0x53e   :  { %v477_v34 = vpop.xlane.xlu0 %476  ;;  %v474_v35 = vpop.xlane.xlu1 %473 }
 0x53f   :  { %1214 = vrcp.f32 %v474_v35 }
 0x540   :  { %1216 = vrcp.f32 %v477_v34 }
 0x542   :  { %v471_v36 = vpop.xlane.xlu0 %470 }
 0x543   :  { %1218 = vrcp.f32 %v471_v36 }
 0x544   :  { %1220 = vrcp.f32 %v480_v33 }
 0x546   :  { %v489_v37 = vpop.xlane.xlu0 %488 }
 0x547   :  { %v492_v38 = vpop.xlane.xlu1 %491  ;;  %1222 = vrcp.f32 %v489_v37 }
 0x548   :  { %1224 = vrcp.f32 %v492_v38 }
 0x54a   :  { %v483_v39 = vpop.xlane.xlu0 %482 }
 0x54b   :  { %1226 = vrcp.f32 %v483_v39  ;;  %v486_v40 = vpop.xlane.xlu1 %485 }
 0x54c   :  { %1228 = vrcp.f32 %v486_v40  ;;  %v1215_v55 = vpop.eup %1214 }
 0x54d   :  { %v1217_v41 = vpop.eup %1216  ;;  %v496_v46 = vmul.f32 %v1215_v55, %v1201_v19 }
 0x54e   :  { %v514_v44 = vpop.permute.xlu0 %513  ;;  %v498_v47 = vmul.f32 %v1217_v41, %v1203_v20 }
 0x54f   :  { %v516_v42 = vpop.permute.xlu1 %515 }
 0x550   :  { %v1219_v49 = vpop.eup %1218  ;;  %1081 = vmatprep.subr.bf16.mxu0 %v516_v42 }
 0x551   :  { %v1221_v43 = vpop.eup %1220  ;;  %1082 = vmatpush3.bf16.msra.mxu0 %v516_v42  ;;  %v494_v45 = vmul.f32 %v1219_v49, %v1205_v23  ;;  %v1174_v42 = vld [vmem:[%s1722_s5 + $0x30] ss:$8 sps:$4 sm:$0xff]   ;;  %v1177_v49 = vld [vmem:[%s1722_s5 + $0x20] ss:$8 sps:$4 sm:$0xff]  }
 0x552   :  { %1083 = vmatprep.subr.bf16.mxu0 %v514_v44  ;;  %v500_v50 = vmul.f32 %v1221_v43, %v1199_v16  ;;  %v1182_v43 = vld [vmem:[%s1722_s5 + $0x14] ss:$8 sps:$4 sm:$0xff]  }
 0x553   :  { %v509_v48 = vpack.c.bf16 %v496_v46, %v494_v45  ;;  %v1185_v45 = vld [vmem:[%s1722_s5 + $0x4] ss:$8 sps:$4 sm:$0xff]   ;;  %v1183_v46 = vld [vmem:[%s1722_s5] ss:$8 sps:$4 sm:$0xff]  }
 0x554   :  { %v1223_v52 = vpop.eup %1222  ;;  %v510_v53 = vpack.c.bf16 %v500_v50, %v498_v47  ;;  %v1432_v47 = vmov 0  }
 0x555   :  { %1084 = vmatpush3.bf16.msra.mxu0 %v514_v44  ;;  %1085 = vmatprep.mubr.msk.bf16.mxu0 %vm135_vm0, %v509_v48  ;;  %v1225_v56 = vpop.eup %1224  ;;  %v506_v61 = vmul.f32 %v1223_v52, %v1207_v25  ;;  %v1180_v44 = vld [vmem:[%s1722_s5 + $0x10] ss:$8 sps:$4 sm:$0xff]  }
 0x556   :  { %1093 = vmatprep.subr.bf16.mxu0 %v1423_v7  ;;  %v508_v62 = vmul.f32 %v1225_v56, %v1209_v26  ;;  %820 = vmatprep.mubr.bf16.mxu1 %v1432_v47 }
 0x558   :  { %v1227_v57 = vpop.eup %1226  ;;  %1086 = vmatmul.mubr.msk.bf16.vlgmr.msra.gmra.mxu0 %vm135_vm0, %v510_v53  ;;  %v512_v2 = vpack.c.bf16 %v508_v62, %v506_v61  ;;  %v994_v61 = vld [vmem:[#allocation8] ss:$0 sm:$0xff] }
 0x559   :  { %v1229_v58 = vpop.eup %1228  ;;  %v502_v59 = vmul.f32 %v1227_v57, %v1211_v28  ;;  %1094 = vmatpush3.bf16.msra.mxu0 %v1170_v3 }
 0x55a   :  { %v504_v60 = vmul.f32 %v1229_v58, %v1213_v30  ;;  %1095 = vmatprep.subr.bf16.mxu0 %v1423_v7 }
 0x55c   :  { %v511_v63 = vpack.c.bf16 %v504_v60, %v502_v59 }
 0x55d   :  { %1096 = vmatpush3.bf16.msra.mxu0 %v1171_v4  ;;  %v1186_v4 = vld [vmem:[%s1723_s6 + $0x38] sm:$0xff]  }
 0x55e   :  { %1089 = vmatprep.mubr.msk.bf16.mxu0 %vm135_vm0, %v511_v63  ;;  %1097 = vmatprep.subr.bf16.mxu0 %v1423_v7 }
 0x560   :  { %1090 = vmatmul.mubr.msk.bf16.gmra.mxu0 %vm135_vm0, %v512_v2 }
 0x561   :  { %1101 = vmatprep.mubr.msk.bf16.mxu0 %vm1424_vm1, %v1423_v7  ;;  %1098 = vmatpush3.bf16.msra.mxu0 %v1172_v6  ;;  %v1190_v6 = vld [vmem:[%s1723_s6 + $0x18] sm:$0xff]  }
 0x562   :  { %1099 = vmatprep.subr.bf16.mxu0 %v1423_v7 }
 0x565   :  { %1100 = vmatpush3.bf16.msra.mxu0 %v1173_v10  ;;  %v1193_v10 = vld [vmem:[%s1723_s6] sm:$0xff]  }
 0x566   :  { %1105 = vmatprep.subr.bf16.mxu0 %v1423_v7 }
 0x618   :  { %v1087_v5 = vpop.f32.mrf.mxu0 }
 0x61a   :  { %v571_v54 = vpop.f32.mrf.mxu0 }
 0x61c   :  { %v1088_v51 = vpop.f32.mrf.mxu0 }
 0x61e   :  { %v574_v8 = vpop.f32.mrf.mxu0 }
 0x620   :  { %v1091_v9 = vpop.f32.mrf.mxu0 }
 0x621   :  { %v1151_v11 = vpack.i.bf16 %v1091_v9, %v1087_v5  ;;  %v1187_v5 = vld [vmem:[%s1723_s6 + $0x30] sm:$0xff]   ;;  %v1192_v9 = vld [vmem:[%s1723_s6 + $0x8] sm:$0xff]  }
 0x622   :  { %v587_v12 = vpop.f32.mrf.mxu0 }
 0x623   :  { %1152 = vrot.lane.b32.xlu0 %v1151_v11, %s1429_s8 }
 0x624   :  { %v1092_v13 = vpop.f32.mrf.mxu0 }
 0x625   :  { %v1161_v16 = vpack.i.bf16 %v1092_v13, %v1088_v51  ;;  %v1189_v51 = vld [vmem:[%s1723_s6 + $0x20] sm:$0xff]  }
 0x626   :  { %v590_v14 = vpop.f32.mrf.mxu0 }
 0x627   :  { %v1156_v15 = vpack.i.bf16 %v590_v14, %v574_v8  ;;  %v1191_v8 = vld [vmem:[%s1723_s6 + $0x10] sm:$0xff]  }
 0x629   :  { %1157 = vrot.lane.b32.xlu1 %v1156_v15, %s1430_s0 }
 0x62d   :  { %1162 = vrot.lane.b32.xlu1 %v1161_v16, %s1431_s27 }
 0x695   :  { %v1153_v18 = vpop.permute.xlu0 %1152 }
 0x696   :  { %v1155_v23 = vunpack.i.h.bf16 %v1153_v18  ;;  %v1154_v24 = vunpack.i.l.bf16 %v1153_v18 }
 0x69b   :  { %v1158_v17 = vpop.permute.xlu1 %1157 }
 0x69c   :  { %v1160_v19 = vunpack.i.h.bf16 %v1158_v17  ;;  %v1159_v20 = vunpack.i.l.bf16 %v1158_v17 }
 0x69e   :  { %v631_v21 = vsel %vm307_vm2, %v587_v12, %v1160_v19  ;;  %v614_v22 = vsel %vm307_vm2, %v571_v54, %v1159_v20  ;;  %v1188_v54 = vld [vmem:[%s1723_s6 + $0x28] sm:$0xff]   ;;  %s1433_s6 = smov [#allocation14]  }
 0x69f   :  { %v1163_v25 = vpop.permute.xlu1 %1162  ;;  %v616_v28 = vsel %vm615_vm3, %v614_v22, %v1154_v24  ;;  %v632_v29 = vsel %vm615_vm3, %v631_v21, %v1155_v23  ;;  %s960_s13 = sshll.u32 %s1433_s6, 4  ;;  %s961_s13 = int_to_ptr.vmem [resolvable:$true] %s960_s13 }
 0x6a0   :  { %v1165_v26 = vunpack.i.h.bf16 %v1163_v25  ;;  %v1164_v27 = vunpack.i.l.bf16 %v1163_v25  ;;  %s1382_s14 = scalar_lea.vmem %s961_s13, 256  ;;  %p1387_p8 = scmp.lt.s32.totalorder %s961_s13, %s961_s13 }
 0x6a1   :  { %p1383_p7 = scmp.ne.s32.totalorder %s961_s13, %s1382_s14  ;;  %p1388_p9 = scmp.lt.s32.totalorder %s1382_s14, %s1382_s14 }
 0x6a2   :  { %v618_v30 = vsel %vm617_vm4, %v616_v28, %v1164_v27  ;;  %v633_v31 = vsel %vm617_vm4, %v632_v29, %v1165_v26 }
 0x6a3   :  { %v634_v32 = vpack.c.bf16 %v633_v31, %v618_v30  ;;  %p1389_p10 = por %p1388_p9, %p1387_p8 }
 0x6a5   :  { %1102 = vmatmul.mubr.msk.bf16.vlgmr.msra.gmra.mxu0 %vm135_vm0, %v634_v32  ;;  %p1390_p11 = pnand %p1389_p10, %p1383_p7 }
 0x6a6   :  { %1121 = vmatprep.mubr.msk.bf16.mxu0 %vm1424_vm1, %v1423_v7  ;;  %1106 = vmatpush3.bf16.msra.mxu0 %v1186_v4 }
 0x6a7   :  { %1107 = vmatprep.subr.bf16.mxu0 %v1423_v7 }
 0x6aa   :  { %1108 = vmatpush3.bf16.msra.mxu0 %v1187_v5 }
 0x6ab   :  { %1109 = vmatprep.subr.bf16.mxu0 %v1423_v7 }
 0x6ae   :  { %1110 = vmatpush3.bf16.msra.mxu0 %v1188_v54 }
 0x6af   :  { %1111 = vmatprep.subr.bf16.mxu0 %v1423_v7 }
 0x6b2   :  { %1112 = vmatpush3.bf16.msra.mxu0 %v1189_v51 }
 0x6b3   :  { %1113 = vmatprep.subr.bf16.mxu0 %v1423_v7 }
 0x6b6   :  { %1114 = vmatpush3.bf16.msra.mxu0 %v1190_v6 }
 0x6b7   :  { %1115 = vmatprep.subr.bf16.mxu0 %v1423_v7 }
 0x6ba   :  { %1116 = vmatpush3.bf16.msra.mxu0 %v1191_v8 }
 0x6bb   :  { %1117 = vmatprep.subr.bf16.mxu0 %v1423_v7 }
 0x6be   :  { %1118 = vmatpush3.bf16.msra.mxu0 %v1192_v9 }
 0x6bf   :  { %1119 = vmatprep.subr.bf16.mxu0 %v1423_v7 }
 0x6c2   :  { %1120 = vmatpush3.bf16.msra.mxu0 %v1193_v10 }
 0x765   :  { %v704_v33 = vpop.f32.mrf.mxu0 }
 0x766   :  { %v1638_v34 = vadd.f32 %v704_v33, %v1529_v0  ;;  %v1176_v0 = vld [vmem:[%s1722_s5 + $0x34] ss:$8 sps:$4 sm:$0xff]  }
 0x767   :  { %v1103_v35 = vpop.f32.mrf.mxu0  ;;  %796 = vmatprep.subr.bf16.mxu1 %v1176_v0 }
 0x768   :  { %v711_v36 = vmul.f32 %v1638_v34, %v1638_v34  ;;  %797 = vmatpush1.bf16.msra.mxu1 %v1174_v42 }
 0x769   :  { %v707_v37 = vpop.f32.mrf.mxu0 }
 0x76a   :  { %v1643_v38 = vadd.f32 %v707_v37, %v1531_v1  ;;  %v713_v39 = vsel %vm135_vm0, %v711_v36, 0.0  ;;  %v1179_v1 = vld [vmem:[%s1722_s5 + $0x24] ss:$8 sps:$4 sm:$0xff]  }
 0x76b   :  { %714 = vadd.xlane.f32.xlu0 %v713_v39  ;;  %v1104_v40 = vpop.f32.mrf.mxu0  ;;  %798 = vmatprep.subr.bf16.mxu1 %v1179_v1 }
 0x76c   :  { %v712_v55 = vmul.f32 %v1643_v38, %v1643_v38  ;;  %799 = vmatpush1.bf16.msra.mxu1 %v1177_v49 }
 0x76d   :  { %800 = vmatprep.subr.bf16.mxu1 %v1182_v43 }
 0x76e   :  { %v716_v41 = vsel %vm135_vm0, %v712_v55, 0.0 }
 0x76f   :  { %717 = vadd.xlane.f32.xlu1 %v716_v41 }
 0x770   :  { %801 = vmatpush1.bf16.msra.mxu1 %v1180_v44 }
 0x771   :  { %802 = vmatprep.subr.bf16.mxu1 %v1185_v45 }
 0x774   :  { %803 = vmatpush1.bf16.msra.mxu1 %v1183_v46 }
 0x7f4   :  { %v715_v48 = vpop.xlane.xlu0 %714 }
 0x7f5   :  { %v719_v50 = vmul.f32 0.015625, %v715_v48 }
 0x7f7   :  { %v721_v52 = vadd.f32 1e-05, %v719_v50 }
 0x7f8   :  { %v718_v53 = vpop.xlane.xlu1 %717 }
 0x7f9   :  { %1230 = vrsqrt.f32 %v721_v52  ;;  %v720_v56 = vmul.f32 0.015625, %v718_v53 }
 0x7fb   :  { %v722_v57 = vadd.f32 1e-05, %v720_v56 }
 0x7fd   :  { %1232 = vrsqrt.f32 %v722_v57 }
 0x806   :  { %v1231_v58 = vpop.eup %1230 }
 0x807   :  { %v725_v59 = vmul.f32 %v1231_v58, %v1638_v34 }
 0x809   :  { %v734_v63 = vmul.f32 %v994_v61, %v725_v59 }
 0x80a   :  { %v1233_v60 = vpop.eup %1232 }
 0x80b   :  { %v726_v62 = vmul.f32 %v1233_v60, %v1643_v38 }
 0x80d   :  { %v735_v2 = vmul.f32 %v994_v61, %v726_v62 }
 0x80f   :  { %v736_v3 = vpack.c.bf16 %v735_v2, %v734_v63 }
 0x811   :  { %1003 = vmatmul.mubr.msk.bf16.vlgmr.msra.gmra.mxu1 %vm135_vm0, %v736_v3 }
 0x8d1   :  { %v822_v11 = vpop.f32.mrf.mxu1 }
 0x8d2   :  { %v1004_v12 = vmul.f32 -1.442695, %v822_v11 }
 0x8d3   :  { %v824_v13 = vpop.f32.mrf.mxu1 }
 0x8d4   :  { %1234 = vpow2.f32 %v1004_v12 }
 0x8d5   :  { %v826_v14 = vpop.f32.mrf.mxu1 }
 0x8d6   :  { %v1005_v15 = vmul.f32 -1.442695, %v826_v14 }
 0x8d7   :  { %v828_v23 = vpop.f32.mrf.mxu1 }
 0x8d8   :  { %1236 = vpow2.f32 %v1005_v15 }
 0x8e1   :  { %v1235_v16 = vpop.eup %1234 }
 0x8e2   :  { %v837_v17 = vadd.f32 1.0, %v1235_v16 }
 0x8e4   :  { %1238 = vrcp.f32 %v837_v17 }
 0x8e5   :  { %v1237_v18 = vpop.eup %1236 }
 0x8e6   :  { %v838_v19 = vadd.f32 1.0, %v1237_v18 }
 0x8e8   :  { %1240 = vrcp.f32 %v838_v19 }
 0x8f1   :  { %v1239_v20 = vpop.eup %1238 }
 0x8f2   :  { %v843_v7 = vmul.f32 %v1239_v20, %v822_v11 }
 0x8f4   :  { %v845_v24 = vmul.f32 %v843_v7, %v824_v13 }
 0x8f5   :  { %v1241_v21 = vpop.eup %1240 }
 0x8f6   :  { %v844_v22 = vmul.f32 %v1241_v21, %v826_v14 }
 0x8f8   :  { %v846_v25 = vmul.f32 %v844_v22, %v828_v23 }
 0x8fa   :  { %v847_v26 = vpack.c.bf16 %v846_v25, %v845_v24 }
 0x8fc   :  { %1122 = vmatmul.mubr.bf16.vlgmr.msra.gmra.mxu0 %v847_v26 }
 0x9bc   :  { %v946_v27 = vpop.f32.mrf.mxu0 }
 0x9bd   :  { %v947_v28 = vadd.f32 %v946_v27, %v1638_v34 }
 0x9be   :  { %v1123_v29 = vpop.f32.mrf.mxu0 }
 0x9bf   :  { %953 = vst.msk [vmem:[#allocation14] sm:$0xff] %vm135_vm0, %v947_v28 }
 0x9c0   :  { %v949_v30 = vpop.f32.mrf.mxu0 }
 0x9c1   :  { %v950_v31 = vadd.f32 %v949_v30, %v1643_v38 }
 0x9c2   :  { %v1124_v32 = vpop.f32.mrf.mxu0 }
 0x9c3   :  { %954 = vst.msk [vmem:[#allocation14 + $0x8] sm:$0xff] %vm135_vm0, %v950_v31 }
 0x9c4   :  { %1393 = shalt.err (!%p1390_p11)
}
 0x9c5   :  { %966 = dma.vmem_to_hbm [thread:$0]  %s961_s13, 256, %s1728_s11, [#allocation4], %s1416_s1, %s1416_s1, %s1417_s15  }
 0x9c6   :  { %1410 = dma.done.wait [#allocation4], 256  }
 0x9c7   :  { %1411 = vsyncadd [#allocation4], 4294967040 }
 0x9c8   :  { %970 = vsyncpa [#allocation3], 1 }
 0x9c9   :  { %971 = vsyncpa [#allocation6], 1 }
 0x9ca   :  { %972 = vsyncpa [#allocation9], 1 }
 0x9cb   :  { %973 = vsyncpa [#allocation12], 1 }
 0x9cc   :  { %974 = vsyncpa [#allocation4], 1 }

</bundles_post_ra>
